<compile_context>
chip_gen: v5e
topology: v5e:2x2
jax: 0.10.0
libtpu: 0.0.40
codegen_flags: <defaults>
</compile_context>

<pallas_src>
import math

import jax
import jax.numpy as jnp
from jax import lax
from jax.experimental import pallas as pl
from jax.experimental.pallas import tpu as pltpu


_NEG_PAD_BIAS = -1e9   # elu(-1e9) + 1 == exp(-1e9) == 0  -> padded Q/K lanes are 0


# ---------------------------------------------------------------------------
# Pass 1: per-batch  W_eff = (sum over S-chunks of K^T V) @ Wo^T   (Dp,Dp) fp32
# ---------------------------------------------------------------------------
def _kv_weff_kernel(x_ref, wk_ref, bk_ref, wv_ref, bv_ref, wo_ref,
                    weff_ref, kv_acc):
    c = pl.program_id(1)

    @pl.when(c == 0)
    def _():
        kv_acc[...] = jnp.zeros_like(kv_acc)

    x = x_ref[0]                                              # (s_chunk, Dp) bf16

    k = jnp.dot(x, wk_ref[...], preferred_element_type=jnp.float32) + bk_ref[...]
    v = jnp.dot(x, wv_ref[...], preferred_element_type=jnp.float32) + bv_ref[...]
    k = jnp.where(k > 0, k + 1.0, jnp.exp(k))                 # elu(k)+1, fp32

    # KV += K^T @ V, contracting the S axis directly (no transpose materialized).
    kv_acc[...] += lax.dot_general(
        k.astype(jnp.bfloat16), v.astype(jnp.bfloat16),
        dimension_numbers=(((0,), (0,)), ((), ())),
        preferred_element_type=jnp.float32)

    @pl.when(c == pl.num_programs(1) - 1)
    def _():
        # Fold the output projection into KV:  W_eff = KV @ Wo^T.
        weff_ref[0] = jnp.dot(kv_acc[...].astype(jnp.bfloat16), wo_ref[...],
                              preferred_element_type=jnp.float32)


# ---------------------------------------------------------------------------
# Pass 2: out_chunk = (elu(x_chunk @ Wq^T + bq) + 1) @ W_eff + bo
# ---------------------------------------------------------------------------
def _q_out_kernel(x_ref, wq_ref, bq_ref, weff_ref, bo_ref, o_ref):
    x = x_ref[0]                                              # (s_chunk, Dp) bf16
    q = jnp.dot(x, wq_ref[...], preferred_element_type=jnp.float32) + bq_ref[...]
    q = jnp.where(q > 0, q + 1.0, jnp.exp(q))                 # elu(q)+1, fp32
    out = jnp.dot(q.astype(jnp.bfloat16), weff_ref[0].astype(jnp.bfloat16),
                  preferred_element_type=jnp.float32) + bo_ref[...]
    o_ref[0] = out


def _pick_s_chunk(S, target=512):
    """Largest chunk <= target that divides S and is a multiple of 8."""
    if S <= target:
        return S
    for c in range(target, 7, -1):
        if S % c == 0 and c % 8 == 0:
            return c
    return S   # TODO(synk): pad + row-mask ragged S instead of full residency.


def linear_attention_bsd(x_bsd, params, *, s_chunk=None):
    """Linear attention on a (B, S, D) input; returns (B, S, D) float32."""
    B, S, D = x_bsd.shape
    Dp = ((D + 127) // 128) * 128          # lane-dense / MXU-friendly width
    pad_d = Dp - D
    if s_chunk is None:
        s_chunk = _pick_s_chunk(S)
    assert S % s_chunk == 0, (S, s_chunk)
    num_c = S // s_chunk

    # bf16 MXU operands; weights pre-transposed so y = x @ W^T  ==  x @ Wt.
    def pad_w(w):
        return jnp.pad(w.T, ((0, pad_d), (0, pad_d))).astype(jnp.bfloat16)

    def pad_b(b, fill=0.0):
        return jnp.pad(b, (0, pad_d),
                       constant_values=fill).reshape(1, Dp).astype(jnp.float32)

    wq_t, wk_t, wv_t, wo_t = (pad_w(params[n]) for n in ("wq", "wk", "wv", "wo"))
    bq = pad_b(params["bq"], _NEG_PAD_BIAS)   # padded Q lanes -> elu+1 == 0
    bk = pad_b(params["bk"], _NEG_PAD_BIAS)   # padded K lanes -> elu+1 == 0
    bv = pad_b(params["bv"])
    bo = pad_b(params["bo"])

    x_p = jnp.pad(x_bsd, ((0, 0), (0, 0), (0, pad_d))).astype(jnp.bfloat16)

    x_spec = pl.BlockSpec((1, s_chunk, Dp), lambda b, c: (b, c, 0))
    o_spec = pl.BlockSpec((1, s_chunk, Dp), lambda b, c: (b, c, 0))
    w_spec = pl.BlockSpec((Dp, Dp), lambda b, c: (0, 0))
    b_spec = pl.BlockSpec((1, Dp), lambda b, c: (0, 0))
    weff_spec = pl.BlockSpec((1, Dp, Dp), lambda b, c: (b, 0, 0))

    # ---- pass 1: W_eff = (K^T V) @ Wo^T per batch -----------------------------
    cost1 = pl.CostEstimate(
        flops=int(B * (6 * S * Dp * Dp + 2 * Dp ** 3)),
        transcendentals=int(B * S * Dp),
        bytes_accessed=int(B * S * Dp * 2 + 3 * Dp * Dp * 2 + B * Dp * Dp * 4),
    )
    weff = pl.pallas_call(
        _kv_weff_kernel,
        out_shape=jax.ShapeDtypeStruct((B, Dp, Dp), jnp.float32),
        grid_spec=pltpu.PrefetchScalarGridSpec(
            num_scalar_prefetch=0,
            grid=(B, num_c),
            in_specs=[x_spec, w_spec, b_spec, w_spec, b_spec, w_spec],
            out_specs=weff_spec,
            scratch_shapes=[pltpu.VMEM((Dp, Dp), jnp.float32)],
        ),
        compiler_params=pltpu.CompilerParams(
            dimension_semantics=("parallel", "arbitrary")),
        cost_estimate=cost1,
    )(x_p, wk_t, bk, wv_t, bv, wo_t)

    # ---- pass 2: out = (elu(x@Wq^T+bq)+1) @ W_eff + bo -------------------------
    cost2 = pl.CostEstimate(
        flops=int(4 * B * S * Dp * Dp),
        transcendentals=int(B * S * Dp),
        bytes_accessed=int(B * S * Dp * 2 + Dp * Dp * 2 + B * Dp * Dp * 4
                           + B * S * Dp * 4),
    )
    out_p = pl.pallas_call(
        _q_out_kernel,
        out_shape=jax.ShapeDtypeStruct((B, S, Dp), jnp.float32),
        grid_spec=pltpu.PrefetchScalarGridSpec(
            num_scalar_prefetch=0,
            grid=(B, num_c),
            in_specs=[x_spec, w_spec, b_spec, weff_spec, b_spec],
            out_specs=o_spec,
        ),
        compiler_params=pltpu.CompilerParams(
            dimension_semantics=("parallel", "parallel")),
        cost_estimate=cost2,
    )(x_p, wq_t, bq, weff, bo)

    return out_p[..., :D] if pad_d else out_p


def linear_attention(x_sbd, params, *, s_chunk=None):
    """PyTorch-layout wrapper: x is (S, B, D) like the nn.Module; returns (S, B, D).

    Prefer linear_attention_bsd() if the surrounding model already works in
    (B, S, D) — it avoids the two HBM transpose passes below.
    """
    x_bsd = jnp.transpose(x_sbd, (1, 0, 2))
    out = linear_attention_bsd(x_bsd, params, s_chunk=s_chunk)
    return jnp.transpose(out, (1, 0, 2))


def _reference(x_sbd, params):
    """Pure-JAX fp32 reference mirroring the PyTorch forward exactly."""
    def lin(x, w, b):
        return x @ w.T + b
    Q = lin(x_sbd, params["wq"], params["bq"])
    K = lin(x_sbd, params["wk"], params["bk"])
    V = lin(x_sbd, params["wv"], params["bv"])
    elu1 = lambda t: jnp.where(t > 0, t + 1.0, jnp.exp(t))
    Q = elu1(Q)
    K = elu1(K)
    Kb = jnp.transpose(K, (1, 2, 0))               # (B, D, S)
    Vb = jnp.transpose(V, (1, 0, 2))               # (B, S, D)
    KV = jnp.einsum("bds,bse->bde", Kb, Vb)        # (B, D, D)
    Qb = jnp.transpose(Q, (1, 0, 2))               # (B, S, D)
    out = jnp.einsum("bsd,bde->bse", Qb, KV)       # (B, S, D)
    out = jnp.transpose(out, (1, 0, 2))            # (S, B, D)
    return lin(out, params["wo"], params["bo"])


if __name__ == "__main__":
    S, B, D = 8, 2, 32   # seq, batch, d_model

    key = jax.random.PRNGKey(0)
    keys = jax.random.split(key, 9)
    scale = 1.0 / math.sqrt(D)
    params = {
        "wq": jax.random.uniform(keys[0], (D, D), jnp.float32, -scale, scale),
        "bq": jax.random.uniform(keys[1], (D,),   jnp.float32, -scale, scale),
        "wk": jax.random.uniform(keys[2], (D, D), jnp.float32, -scale, scale),
        "bk": jax.random.uniform(keys[3], (D,),   jnp.float32, -scale, scale),
        "wv": jax.random.uniform(keys[4], (D, D), jnp.float32, -scale, scale),
        "bv": jax.random.uniform(keys[5], (D,),   jnp.float32, -scale, scale),
        "wo": jax.random.uniform(keys[6], (D, D), jnp.float32, -scale, scale),
        "bo": jax.random.uniform(keys[7], (D,),   jnp.float32, -scale, scale),
    }
    x = jax.random.normal(keys[8], (S, B, D), jnp.float32)

    out = jax.block_until_ready(linear_attention(x, params))
    ref = jax.block_until_ready(_reference(x, params))

    assert out.shape == (S, B, D)
    # bf16 MXU operands (per perf review) -> bf16-appropriate tolerance,
    # normalized to the output scale.
    err = float(jnp.max(jnp.abs(out - ref)) /
                jnp.maximum(jnp.max(jnp.abs(ref)), 1e-6))
    assert err < 5e-2, err
    print("KERNEL_OK")
</pallas_src>

<mosaic_0001>
module attributes {stable_mosaic.version = 11 : i64} {
  func.func @_kv_weff_kernel(%arg0: i32, %arg1: i32, %arg2: memref<1x8x128xbf16, #tpu.memory_space<vmem>>, %arg3: memref<128x128xbf16, #tpu.memory_space<vmem>>, %arg4: memref<1x128xf32, #tpu.memory_space<vmem>>, %arg5: memref<128x128xbf16, #tpu.memory_space<vmem>>, %arg6: memref<1x128xf32, #tpu.memory_space<vmem>>, %arg7: memref<128x128xbf16, #tpu.memory_space<vmem>>, %arg8: memref<1x128x128xf32, #tpu.memory_space<vmem>>, %arg9: memref<128x128xf32, #tpu.memory_space<vmem>>) attributes {dimension_semantics = [#tpu.dimension_semantics<parallel>, #tpu.dimension_semantics<arbitrary>], iteration_bounds = array<i64: 2, 1>, scalar_prefetch = 0 : i64, scratch_operands = 1 : i64, tpu.core_type = #tpu.core_type<tc>, window_params = [{transform_indices = @transform_0, window_bounds = array<i64: 1, 8, 128>}, {pipeline_mode = #tpu.pipeline_mode<synchronous>, transform_indices = @transform_1, window_bounds = array<i64: 128, 128>}, {pipeline_mode = #tpu.pipeline_mode<synchronous>, transform_indices = @transform_2, window_bounds = array<i64: 1, 128>}, {pipeline_mode = #tpu.pipeline_mode<synchronous>, transform_indices = @transform_3, window_bounds = array<i64: 128, 128>}, {pipeline_mode = #tpu.pipeline_mode<synchronous>, transform_indices = @transform_4, window_bounds = array<i64: 1, 128>}, {pipeline_mode = #tpu.pipeline_mode<synchronous>, transform_indices = @transform_5, window_bounds = array<i64: 128, 128>}, {transform_indices = @transform_6, window_bounds = array<i64: 1, 128, 128>}]} {
    %c0_i32 = arith.constant 0 : i32
    %0 = arith.cmpi eq, %arg1, %c0_i32 : i32
    %1 = arith.extui %0 : i1 to i32
    %c0_i32_0 = arith.constant 0 : i32
    %2 = arith.cmpi ne, %1, %c0_i32_0 : i32
    scf.if %2 {
      %cst_21 = arith.constant 0.000000e+00 : f32
      %30 = vector.broadcast %cst_21 : f32 to vector<128x128xf32>
      %c0_22 = arith.constant 0 : index
      %c0_23 = arith.constant 0 : index
      %31 = vector.load %arg9[%c0_22, %c0_23] : memref<128x128xf32, #tpu.memory_space<vmem>>, vector<128x128xf32>
      tpu.vector_store %arg9[%c0_22, %c0_23], %30 {strides = array<i32>} : memref<128x128xf32, #tpu.memory_space<vmem>>, vector<128x128xf32>,
    } else {
    }
    %c0 = arith.constant 0 : index
    %c0_1 = arith.constant 0 : index
    %c0_2 = arith.constant 0 : index
    %3 = vector.load %arg2[%c0, %c0_1, %c0_2] : memref<1x8x128xbf16, #tpu.memory_space<vmem>>, vector<1x8x128xbf16>
    %4 = vector.shape_cast %3 : vector<1x8x128xbf16> to vector<8x128xbf16>
    %c0_3 = arith.constant 0 : index
    %c0_4 = arith.constant 0 : index
    %5 = vector.load %arg3[%c0_3, %c0_4] : memref<128x128xbf16, #tpu.memory_space<vmem>>, vector<128x128xbf16>
    %cst = arith.constant dense<0.000000e+00> : vector<8x128xf32>
    %6 = tpu.matmul %4, %5, %cst {dimension_numbers = #tpu.dot_dimension_numbers<[1], [0], [0], [1], [0, 0, 1, 1], [], []>} : vector<8x128xbf16>, vector<128x128xbf16>, vector<8x128xf32> -> vector<8x128xf32>
    %c0_5 = arith.constant 0 : index
    %c0_6 = arith.constant 0 : index
    %7 = vector.load %arg4[%c0_5, %c0_6] : memref<1x128xf32, #tpu.memory_space<vmem>>, vector<1x128xf32>
    %8 = vector.broadcast %7 : vector<1x128xf32> to vector<8x128xf32>
    %9 = arith.addf %6, %8 : vector<8x128xf32>
    %c0_7 = arith.constant 0 : index
    %c0_8 = arith.constant 0 : index
    %10 = vector.load %arg5[%c0_7, %c0_8] : memref<128x128xbf16, #tpu.memory_space<vmem>>, vector<128x128xbf16>
    %cst_9 = arith.constant dense<0.000000e+00> : vector<8x128xf32>
    %11 = tpu.matmul %4, %10, %cst_9 {dimension_numbers = #tpu.dot_dimension_numbers<[1], [0], [0], [1], [0, 0, 1, 1], [], []>} : vector<8x128xbf16>, vector<128x128xbf16>, vector<8x128xf32> -> vector<8x128xf32>
    %c0_10 = arith.constant 0 : index
    %c0_11 = arith.constant 0 : index
    %12 = vector.load %arg6[%c0_10, %c0_11] : memref<1x128xf32, #tpu.memory_space<vmem>>, vector<1x128xf32>
    %13 = vector.broadcast %12 : vector<1x128xf32> to vector<8x128xf32>
    %14 = arith.addf %11, %13 : vector<8x128xf32>
    %cst_12 = arith.constant 0.000000e+00 : f32
    %15 = vector.broadcast %cst_12 : f32 to vector<8x128xf32>
    %16 = arith.cmpf ogt, %9, %15 : vector<8x128xf32>
    %cst_13 = arith.constant 1.000000e+00 : f32
    %17 = vector.broadcast %cst_13 : f32 to vector<8x128xf32>
    %18 = arith.addf %9, %17 : vector<8x128xf32>
    %19 = math.exp %9 : vector<8x128xf32>
    %20 = arith.select %16, %18, %19 : vector<8x128xi1>, vector<8x128xf32>
    %c0_14 = arith.constant 0 : index
    %c0_15 = arith.constant 0 : index
    %21 = vector.load %arg9[%c0_14, %c0_15] : memref<128x128xf32, #tpu.memory_space<vmem>>, vector<128x128xf32>
    %22 = arith.truncf %20 : vector<8x128xf32> to vector<8x128xbf16>
    %23 = arith.truncf %14 : vector<8x128xf32> to vector<8x128xbf16>
    %cst_16 = arith.constant dense<0.000000e+00> : vector<128x128xf32>
    %24 = tpu.matmul %22, %23, %cst_16 {dimension_numbers = #tpu.dot_dimension_numbers<[0], [0], [1], [1], [0, 1, 1, 1], [], []>} : vector<8x128xbf16>, vector<8x128xbf16>, vector<128x128xf32> -> vector<128x128xf32>
    %25 = arith.addf %21, %24 : vector<128x128xf32>
    %c0_17 = arith.constant 0 : index
    %c0_18 = arith.constant 0 : index
    %26 = vector.load %arg9[%c0_17, %c0_18] : memref<128x128xf32, #tpu.memory_space<vmem>>, vector<128x128xf32>
    tpu.vector_store %arg9[%c0_17, %c0_18], %25 {strides = array<i32>} : memref<128x128xf32, #tpu.memory_space<vmem>>, vector<128x128xf32>,
    %c0_i32_19 = arith.constant 0 : i32
    %27 = arith.cmpi eq, %arg1, %c0_i32_19 : i32
    %28 = arith.extui %27 : i1 to i32
    %c0_i32_20 = arith.constant 0 : i32
    %29 = arith.cmpi ne, %28, %c0_i32_20 : i32
    scf.if %29 {
      %c0_21 = arith.constant 0 : index
      %c0_22 = arith.constant 0 : index
      %30 = vector.load %arg9[%c0_21, %c0_22] : memref<128x128xf32, #tpu.memory_space<vmem>>, vector<128x128xf32>
      %31 = arith.truncf %30 : vector<128x128xf32> to vector<128x128xbf16>
      %c0_23 = arith.constant 0 : index
      %c0_24 = arith.constant 0 : index
      %32 = vector.load %arg7[%c0_23, %c0_24] : memref<128x128xbf16, #tpu.memory_space<vmem>>, vector<128x128xbf16>
      %cst_25 = arith.constant dense<0.000000e+00> : vector<128x128xf32>
      %33 = tpu.matmul %31, %32, %cst_25 {dimension_numbers = #tpu.dot_dimension_numbers<[1], [0], [0], [1], [0, 0, 1, 1], [], []>} : vector<128x128xbf16>, vector<128x128xbf16>, vector<128x128xf32> -> vector<128x128xf32>
      %c0_26 = arith.constant 0 : index
      %c0_27 = arith.constant 0 : index
      %c0_28 = arith.constant 0 : index
      %34 = vector.load %arg8[%c0_26, %c0_27, %c0_28] : memref<1x128x128xf32, #tpu.memory_space<vmem>>, vector<1x128x128xf32>
      %35 = vector.shape_cast %34 : vector<1x128x128xf32> to vector<128x128xf32>
      %36 = vector.shape_cast %33 : vector<128x128xf32> to vector<1x128x128xf32>
      tpu.vector_store %arg8[%c0_26, %c0_27, %c0_28], %36 {strides = array<i32>} : memref<1x128x128xf32, #tpu.memory_space<vmem>>, vector<1x128x128xf32>,
    } else {
    }
    return
  }
  func.func @transform_0(%arg0: i32, %arg1: i32) -> (i32, i32, i32) {
    %c0_i32 = arith.constant 0 : i32
    %c0_i32_0 = arith.constant 0 : i32
    return %arg0, %arg1, %c0_i32 : i32, i32, i32
  }
  func.func @transform_1(%arg0: i32, %arg1: i32) -> (i32, i32) {
    %c0_i32 = arith.constant 0 : i32
    %c0_i32_0 = arith.constant 0 : i32
    %c0_i32_1 = arith.constant 0 : i32
    return %c0_i32, %c0_i32_0 : i32, i32
  }
  func.func @transform_2(%arg0: i32, %arg1: i32) -> (i32, i32) {
    %c0_i32 = arith.constant 0 : i32
    %c0_i32_0 = arith.constant 0 : i32
    %c0_i32_1 = arith.constant 0 : i32
    return %c0_i32, %c0_i32_0 : i32, i32
  }
  func.func @transform_3(%arg0: i32, %arg1: i32) -> (i32, i32) {
    %c0_i32 = arith.constant 0 : i32
    %c0_i32_0 = arith.constant 0 : i32
    %c0_i32_1 = arith.constant 0 : i32
    return %c0_i32, %c0_i32_0 : i32, i32
  }
  func.func @transform_4(%arg0: i32, %arg1: i32) -> (i32, i32) {
    %c0_i32 = arith.constant 0 : i32
    %c0_i32_0 = arith.constant 0 : i32
    %c0_i32_1 = arith.constant 0 : i32
    return %c0_i32, %c0_i32_0 : i32, i32
  }
  func.func @transform_5(%arg0: i32, %arg1: i32) -> (i32, i32) {
    %c0_i32 = arith.constant 0 : i32
    %c0_i32_0 = arith.constant 0 : i32
    %c0_i32_1 = arith.constant 0 : i32
    return %c0_i32, %c0_i32_0 : i32, i32
  }
  func.func @transform_6(%arg0: i32, %arg1: i32) -> (i32, i32, i32) {
    %c0_i32 = arith.constant 0 : i32
    %c0_i32_0 = arith.constant 0 : i32
    %c0_i32_1 = arith.constant 0 : i32
    return %arg0, %c0_i32, %c0_i32_0 : i32, i32, i32
  }
}

</mosaic_0001>

<bundles_post_ra>
// kernel: tpu_custom_call.1
= control target key start
LH: loop header
LB: loop body
LE: loop exit
PB: predicated region body
PF: predicated region fallthrough
CT: control target
= control target key end

     0   :  { %s1665_s0 = inlined_call_operand.hbm [shape: bf16[2,8,128], index: 0, kind: input, shape index: {}]   ;;  %s1666_s1 = inlined_call_operand.hbm [shape: bf16[128,128], index: 1, kind: input, shape index: {}]   ;;  %s1667_s2 = inlined_call_operand.vmem [shape: f32[1,128], index: 2, kind: input, shape index: {}]   ;;  %s1668_s3 = inlined_call_operand.hbm [shape: bf16[128,128], index: 3, kind: input, shape index: {}]   ;;  %s1669_s4 = inlined_call_operand.vmem [shape: f32[1,128], index: 4, kind: input, shape index: {}]   ;;  %s1670_s5 = inlined_call_operand.hbm [shape: bf16[128,128], index: 5, kind: input, shape index: {}]   ;;  %s1671_s6 = inlined_call_operand.hbm [shape: f32[2,128,128], index: 6, kind: output, shape index: {}]  }
   0x1   :  { %1672 = sst [smem:[#allocation16_spill]] %s1666_s1 }
   0x2   :  { %11 = vsyncpa [#allocation4], 0 }
   0x3   :  { %13 = vsyncpa [#allocation4 + $0x1], 0 }
   0x4   :  { %14 = vsyncpa [#allocation7], 0 }
   0x5   :  { %15 = vsyncpa [#allocation10], 0 }
   0x6   :  { %16 = vsyncpa [#allocation5], 0 }
   0x7   :  { %18 = vsyncpa [#allocation5 + $0x1], 0  ;;  %s1464_s21 = smov 0   ;;  %s1466_s22 = smov 0  }
   0x8   :  { %s1468_s23 = smov 0   ;;  %s1470_s24 = smov 0  }
   0x9   :  { %s1472_s25 = smov 0   ;;  %s1474_s26 = smov 0  }
   0xa LB: > { %s950_s27 = sadd.s32 4294967295, %s1420_s26   ;;  %p952_p0 = scmp.ge.s32.totalorder %s1420_s26, 1  ;;  %s1420_s26 = sphi %s1474_s26, %s24_s26   ;;  %s1416_s25 = sphi %s1472_s25, %s1685_s25   ;;  %s1412_s24 = sphi %s1470_s24, %s1684_s24   ;;  %s1408_s23 = sphi %s1468_s23, %s1683_s23   ;;  %s1404_s22 = sphi %s1466_s22, %s1682_s22   ;;  %s1400_s21 = sphi %s1464_s21, %s1681_s21  }
   0xb   : > { %p1498_p1 = scmp.eq.s32.totalorder %s950_s27, 0  ;;  %p200_p2 = scmp.lt.s32.totalorder %s1420_s26, 3 }
   0xc   : > { %s1674_s1 = sld [smem:[#allocation16_spill]]  ;;  %s1422_s9 = smov [#allocation6]  }
   0xd   : > { %p1506_p3 = pnand %p952_p0, %p200_p2  ;;  %s213_s10 = sshll.u32 %s1422_s9, 4  ;;  %s214_s10 = int_to_ptr.vmem [resolvable:$true] %s213_s10 }
   0xe   : > { %p956_p6 = scmp.ge.s32.totalorder %s1420_s26, 2  ;;  %s228_s14 = sshll.u32 %s1668_s3, 4  ;;  %s229_s14 = int_to_ptr.hbm [resolvable:$true] %s228_s14 }
   0xf   : > { %p1124_p4 = pneg %p1506_p3  ;;  %s1423_s15 = smov 64  }
  0x10   : > { %s1424_s16 = smov 4   ;;  %s1425_s17 = smov [#allocation8]  }
  0x11   : > { %p1514_p5 = pnand %p1124_p4, %p1498_p1  ;;  %s230_s18 = sshll.u32 %s1425_s17, 4  ;;  %s231_s18 = int_to_ptr.vmem [resolvable:$true] %s230_s18 }
  0x12   : > { %s211_s7 = sshll.u32 %s1674_s1, 4  ;;  %s245_s29 = sshll.u32 %s1670_s5, 4  ;;  %s212_s7 = int_to_ptr.hbm [resolvable:$true] %s211_s7  ;;  %s246_s29 = int_to_ptr.hbm [resolvable:$true] %s245_s29 }
  0x13   : > { %1127 = dma.hbm_to_vmem [thread:$0]  (!%p1514_p5), %s212_s7, 1024, %s214_s10, [#allocation7], %s1423_s15, %s1423_s15, %s1424_s16  }
  0x14   : > { %1130 = dma.hbm_to_vmem [thread:$0]  (!%p1514_p5), %s229_s14, 1024, %s231_s18, [#allocation7], %s1423_s15, %s1423_s15, %s1424_s16  }
  0x15   : > { %s1426_s30 = smov [#allocation9]   ;;  %s951_s7 = sadd.s32 4294967294, %s1420_s26  }
  0x16   : > { %s247_s9 = sshll.u32 %s1426_s30, 4  ;;  %s36_s10 = sadd.s32 1, %s1416_s25  ;;  %s248_s9 = int_to_ptr.vmem [resolvable:$true] %s247_s9 }
  0x17   : > { %1133 = dma.hbm_to_vmem [thread:$0]  (!%p1514_p5), %s246_s29, 1024, %s248_s9, [#allocation10], %s1423_s15, %s1423_s15, %s1424_s16  }
  0x18   : > { %s45_s12 = sadd.s32 1, %s1408_s23  ;;  %p38_p7 = scmp.ge.s32.totalorder %s36_s10, 2 }
  0x19   : > { %p52_p8 = scmp.ne.s32.totalorder %s1408_s23, %s1404_s22  ;;  %p53_p9 = scmp.eq.s32.totalorder %s1420_s26, 0 }
  0x1a   : > { %p58_p10 = scmp.ne.s32.totalorder %s1404_s22, %s1400_s21  ;;  %s1687_s10 = smov (%p38_p7, %s36_s10), 0 }
  0x1b   : > { %p1541_p11 = por %p53_p9, %p52_p8  ;;  %s40_s14 = ssub.s32 %s1416_s25, %s1687_s10 }
  0x1c   : > { %p1547_p12 = por %p1498_p1, %p58_p10  ;;  %p187_p13 = scmp.eq.s32.totalorder %s950_s27, 1 }
  0x1d   : > { %p43_p0 = scmp.eq.s32.totalorder %s40_s14, 0  ;;  %p193_p2 = scmp.eq.s32.totalorder %s951_s7, 1 }
  0x1e   : > { %p1555_p4 = por %p187_p13, %p52_p8  ;;  %p1145_p5 = scmp.lt.s32.totalorder %s1420_s26, 2 }
  0x1f   : > { %s1561_s16 = scalar_select %p43_p0, %s1408_s23, %s45_s12  }
  0x20   : > { %p1563_p7 = por %p193_p2, %p58_p10  ;;  %s261_s18 = sand.u32 1, %s1408_s23  }
  0x21   : > { %s957_s19 = sshll.u32 %s261_s18, 2  ;;  %s958_s20 = sshll.u32 %s1416_s25, 2 }
  0x22   : > { %s270_s27 = scalar_lea.hbm %s1665_s0, %s958_s20  ;;  %s265_s9 = scalar_lea.vmem [#allocation3], %s957_s19 }
  0x23   : > { %s274_s7 = sshll.u32 %s265_s9, 4  ;;  %s272_s14 = sshll.u32 %s270_s27, 4  ;;  %s275_s7 = int_to_ptr.vmem [resolvable:$true] %s274_s7  ;;  %s273_s14 = int_to_ptr.hbm [resolvable:$true] %s272_s14 }
  0x24   : > { %p1135_p8 = pnand %p1145_p5, %p1541_p11  ;;  %s262_s12 = scalar_lea.sflag [#allocation4], %s261_s18 }
  0x25   : > { %283 = sbr.rel (%p1506_p3) target bundleno = 790 (0x316), region = 44  ;;  %s1577_s1 = sand.u32 (!%p1506_p3), 1, %s1404_s22  }
  0x26   : > { %1137 = dma.hbm_to_vmem [thread:$0]  (!%p1135_p8), %s273_s14, 64, %s275_s7, %s262_s12  }
  0x27   : > { %s960_s29 = sshll.u32 (!%p1506_p3), %s1577_s1, 2  ;;  %s286_s20 = scalar_lea.sflag (!%p1506_p3), [#allocation4], %s1577_s1 }
  0x28   : > { %s289_s19 = scalar_lea.vmem (!%p1506_p3), [#allocation3], %s960_s29 }
  0x2a   : > { %1383 = dma.done.wait (%p1547_p12), %s286_s20, 64  }
  0x2b   : > { %1385 = vsyncadd (%p1547_p12), %s286_s20, 4294967232 }
  0x2c   : > { %1387 = dma.done.wait (%p1498_p1), [#allocation7], 2048  }
  0x2d   : > { %1389 = vsyncadd (%p1498_p1), [#allocation7], 4294965248 }
  0x2e   : > { %1391 = dma.done.wait (%p1498_p1), [#allocation10], 1024  }
  0x2f   : > { %1393 = vsyncadd (%p1498_p1), [#allocation10], 4294966272  ;;  %v1081_v0 = vld [vmem:[#allocation6 + $0x38] sm:$0xff]  ;;  %v1080_v1 = vld [vmem:[#allocation6 + $0x30] sm:$0xff]  ;;  %vm582_vm1 = vcmask 1043456   ;;  %vm557_vm2 = vcmask 64512  }
  0x30   : > { %424 = vmatpush.bf16.msra.mxu0 %v1081_v0  ;;  %v1079_v2 = vld [vmem:[#allocation6 + $0x28] sm:$0xff]  ;;  %v1078_v3 = vld [vmem:[#allocation6 + $0x20] sm:$0xff]  ;;  %v1077_v4 = vld [vmem:[#allocation6 + $0x18] sm:$0xff]  ;;  %s964_s18 = sshll.u32 %s1577_s1, 7  ;;  %s1098_s27 = sshll.u32 %s1412_s24, 7 }
  0x31   : > { %v1076_v5 = vld [vmem:[#allocation6 + $0x10] sm:$0xff]  ;;  %v1075_v6 = vld [vmem:[#allocation6 + $0x8] sm:$0xff]  ;;  %v1074_v7 = vld [vmem:[#allocation6] sm:$0xff]  ;;  %s1608_s30 = scalar_lea.vmem [#allocation11], %s964_s18  ;;  %s835_s14 = scalar_lea.hbm %s1671_s6, %s1098_s27 }
  0x32   : > { %v355_v8 = vld [vmem:[%s289_s19] sm:$0xf]  ;;  %v1088_v10 = vld [vmem:[#allocation8 + $0x30] sm:$0xff]  ;;  %v1087_v11 = vld [vmem:[#allocation8 + $0x28] sm:$0xff]  ;;  %s836_s12 = sshll.u32 %s1608_s30, 4  ;;  %s838_s29 = sshll.u32 %s835_s14, 4  ;;  %s837_s12 = int_to_ptr.vmem [resolvable:$true] %s836_s12  ;;  %s839_s29 = int_to_ptr.hbm [resolvable:$true] %s838_s29 }
  0x33   : > { %v1089_v9 = vld [vmem:[#allocation8 + $0x38] sm:$0xff]  ;;  %v1086_v12 = vld [vmem:[#allocation8 + $0x20] sm:$0xff]  ;;  %v1084_v17 = vld [vmem:[#allocation8 + $0x10] sm:$0xff]  ;;  %s824_s20 = scalar_lea.sflag [#allocation5], %s1577_s1  ;;  %s1344_s19 = sshra.s32 %s839_s29, 4  ;;  %s1345_s19 = int_to_ptr.hbm [resolvable:$true] %s1344_s19 }
  0x34   : > { %425 = vmatpush.bf16.msra.mxu0 %v1080_v1  ;;  %505 = vmatpush.bf16.msra.mxu1 %v1089_v9  ;;  %v1206_v13 = vld [vmem:[%s1667_s2] ss:$0 sm:$0xff]  ;;  %v1083_v19 = vld [vmem:[#allocation8 + $0x8] sm:$0xff]  ;;  %v1082_v21 = vld [vmem:[#allocation8] sm:$0xff]  ;;  %s1346_s28 = scalar_lea.hbm %s1345_s19, 128  ;;  %s1350_s13 = scalar_lea.hbm %s1671_s6, 256 }
  0x35   : > { %v1085_v14 = vld [vmem:[#allocation8 + $0x18] sm:$0xff]  ;;  %v1096_v38 = vld [vmem:[#allocation9 + $0x30] sm:$0xff]  ;;  %v1095_v40 = vld [vmem:[#allocation9 + $0x28] sm:$0xff]  ;;  %p1347_p1 = scmp.ne.s32.totalorder %s1345_s19, %s1346_s28  ;;  %p1351_p10 = scmp.lt.s32.totalorder %s1345_s19, %s1671_s6 }
  0x36   : > { %v1207_v26 = vld [vmem:[%s1669_s4] ss:$0 sm:$0xff]  ;;  %v1094_v41 = vld [vmem:[#allocation9 + $0x20] sm:$0xff]  ;;  %v1092_v43 = vld [vmem:[#allocation9 + $0x10] sm:$0xff]  ;;  %p1352_p11 = scmp.lt.s32.totalorder %s1350_s13, %s1346_s28 }
  0x37   : > { %v1097_v37 = vld [vmem:[#allocation9 + $0x38] sm:$0xff]  ;;  %v1091_v44 = vld [vmem:[#allocation9 + $0x8] sm:$0xff]  ;;  %v1090_v46 = vld [vmem:[#allocation9] sm:$0xff]  ;;  %p1348_p3 = pnand %p1347_p1, %p1555_p4 }
  0x38   : > { %426 = vmatpush.bf16.msra.mxu0 %v1079_v2  ;;  %506 = vmatpush.bf16.msra.mxu1 %v1088_v10  ;;  %v1093_v42 = vld [vmem:[#allocation9 + $0x18] sm:$0xff]  ;;  %p1353_p12 = por %p1352_p11, %p1351_p10 }
  0x39   : > { %1100 = vmatpush.bf16.msra.mxu3 %v1097_v37  ;;  %p1349_p9 = pneg %p1348_p3 }
  0x3b   : > { %p1354_p13 = pnand %p1353_p12, %p1349_p9 }
  0x3c   : > { %427 = vmatpush.bf16.msra.mxu0 %v1078_v3  ;;  %507 = vmatpush.bf16.msra.mxu1 %v1087_v11 }
  0x3d   : > { %1101 = vmatpush.bf16.msra.mxu3 %v1096_v38 }
  0x40   : > { %428 = vmatpush.bf16.msra.mxu0 %v1077_v4  ;;  %508 = vmatpush.bf16.msra.mxu1 %v1086_v12 }
  0x41   : > { %1102 = vmatpush.bf16.msra.mxu3 %v1095_v40 }
  0x44   : > { %429 = vmatpush.bf16.msra.mxu0 %v1076_v5  ;;  %509 = vmatpush.bf16.msra.mxu1 %v1085_v14 }
  0x45   : > { %1103 = vmatpush.bf16.msra.mxu3 %v1094_v41 }
  0x48   : > { %430 = vmatpush.bf16.msra.mxu0 %v1075_v6  ;;  %510 = vmatpush.bf16.msra.mxu1 %v1084_v17 }
  0x49   : > { %1104 = vmatpush.bf16.msra.mxu3 %v1093_v42 }
  0x4c   : > { %431 = vmatpush.bf16.msra.mxu0 %v1074_v7  ;;  %511 = vmatpush.bf16.msra.mxu1 %v1083_v19 }
  0x4d   : > { %1105 = vmatpush.bf16.msra.mxu3 %v1092_v43 }
  0x4f   : > { %432 = vmatmul.bf16.vlgmr.msra.gmra.mxu0 %v355_v8 }
  0x50   : > { %512 = vmatpush.bf16.msra.mxu1 %v1082_v21  ;;  %758 = vmatpush.bf16.msrb.mxu0 %v1097_v37 }
  0x51   : > { %1106 = vmatpush.bf16.msra.mxu3 %v1091_v44 }
  0x53   : > { %513 = vmatmul.bf16.vlgmr.msra.gmra.mxu1 %v355_v8 }
  0x54   : > { %759 = vmatpush.bf16.msrb.mxu0 %v1096_v38 }
  0x55   : > { %1107 = vmatpush.bf16.msra.mxu3 %v1090_v46 }
  0x58   : > { %760 = vmatpush.bf16.msrb.mxu0 %v1095_v40 }
  0x5c   : > { %761 = vmatpush.bf16.msrb.mxu0 %v1094_v41 }
  0x60   : > { %762 = vmatpush.bf16.msrb.mxu0 %v1093_v42 }
  0x64   : > { %763 = vmatpush.bf16.msrb.mxu0 %v1092_v43 }
  0x68   : > { %764 = vmatpush.bf16.msrb.mxu0 %v1091_v44 }
  0x6c   : > { %765 = vmatpush.bf16.msrb.mxu0 %v1090_v46 }
  0xcc   : > { %v433_v15 = vpop.f32.mrf.mxu0 }
  0xcd   : > { %v434_v16 = vadd.f32 %v1206_v13, %v433_v15 }
  0xcf   : > { %v520_v18 = vmul.f32 1.442695, %v434_v16  ;;  %v519_v22 = vadd.f32 1.0, %v434_v16  ;;  %vm518_vm0 = vcmp.gt.f32.partialorder %v434_v16, 0.0 }
  0xd0   : > { %v514_v27 = vpop.f32.mrf.mxu1 }
  0xd1   : > { %1208 = vpow2.f32 %v520_v18  ;;  %v515_v28 = vadd.f32 %v1207_v26, %v514_v27 }
  0xd3   : > { %v540_v29 = vpack.c.bf16 %v515_v28, %v515_v28 }
  0xd4   : > { %v435_v20 = vpop.f32.mrf.mxu0 }
  0xd5   : > { %v584_v30 = vsel %vm582_vm1, %v540_v29, 0 }
  0xd6   : > { %593 = vmatpush.bf16.msrb.mxu1 %v584_v30  ;;  %1099 = vmatpush.bf16.msra.mxu2 %v584_v30 }
  0xd7   : > { %v1209_v23 = vpop.eup %1208 }
  0xd8   : > { %v522_v24 = vsel %vm518_vm0, %v519_v22, %v1209_v23  ;;  %v516_v31 = vpop.f32.mrf.mxu1 }
  0xd9   : > { %v539_v25 = vpack.c.bf16 %v522_v24, %v522_v24 }
  0xdb   : > { %541 = vxpose.xlu0.c.b16.start.end [1/1] (short) %v539_v25, 128 }
 0x187   : > { %v549_v32 = vpop.trf.xlu0 }
 0x188   : > { %1029 = vmatmul.msk.bf16.vlgmr.msrb.gmra.mxu1 %vm557_vm2, %v549_v32 }
 0x197   : > { %v550_v33 = vpop.trf.xlu0 }
 0x198   : > { %1030 = vmatmul.msk.bf16.vlgmr.msra.gmra.mxu2 %vm557_vm2, %v550_v33 }
 0x1a7   : > { %v551_v34 = vpop.trf.xlu0 }
 0x1a8   : > { %1031 = vmatmul.msk.bf16.gmra.mxu2 %vm557_vm2, %v551_v34 }
 0x1b7   : > { %v552_v35 = vpop.trf.xlu0 }
 0x1b8   : > { %1032 = vmatmul.msk.bf16.gmra.mxu2 %vm557_vm2, %v552_v35 }
 0x1c7   : > { %v553_v36 = vpop.trf.xlu0 }
 0x1c8   : > { %1033 = vmatmul.msk.bf16.gmra.mxu2 %vm557_vm2, %v553_v36 }
 0x1d7   : > { %v554_v39 = vpop.trf.xlu0 }
 0x1d8   : > { %1034 = vmatmul.msk.bf16.gmra.mxu2 %vm557_vm2, %v554_v39 }
 0x1e7   : > { %v555_v45 = vpop.trf.xlu0 }
 0x1e8   : > { %1035 = vmatmul.msk.bf16.gmra.mxu2 %vm557_vm2, %v555_v45 }
 0x1f7   : > { %v556_v47 = vpop.trf.xlu0 }
 0x1f8   : > { %1036 = vmatmul.msk.bf16.gmra.mxu2 %vm557_vm2, %v556_v47 }
 0x205   : > { %v595_v48 = vpop.f32.mrf.mxu1 }
 0x20d   : > { %v597_v49 = vpop.f32.mrf.mxu1 }
 0x20e   : > { %v686_v50 = vpack.c.bf16 %v597_v49, %v595_v48 }
 0x210   : > { %766 = vmatmul.bf16.vlgmr.msrb.gmra.mxu0 %v686_v50 }
 0x21b   : > { %v600_v51 = vpop.f32.mrf.mxu2 }
 0x223   : > { %v602_v52 = vpop.f32.mrf.mxu2 }
 0x224   : > { %v687_v53 = vpack.c.bf16 %v602_v52, %v600_v51 }
 0x226   : > { %771 = vmatmul.bf16.gmra.mxu0 %v687_v53 }
 0x22b   : > { %v605_v54 = vpop.f32.mrf.mxu2 }
 0x233   : > { %v607_v55 = vpop.f32.mrf.mxu2 }
 0x234   : > { %v688_v56 = vpack.c.bf16 %v607_v55, %v605_v54 }
 0x236   : > { %776 = vmatmul.bf16.gmra.mxu0 %v688_v56 }
 0x23b   : > { %v610_v57 = vpop.f32.mrf.mxu2 }
 0x243   : > { %v612_v58 = vpop.f32.mrf.mxu2 }
 0x244   : > { %v689_v59 = vpack.c.bf16 %v612_v58, %v610_v57 }
 0x246   : > { %781 = vmatmul.bf16.vlgmr.msra.gmra.mxu3 %v689_v59 }
 0x24b   : > { %v615_v60 = vpop.f32.mrf.mxu2 }
 0x253   : > { %v617_v61 = vpop.f32.mrf.mxu2 }
 0x254   : > { %v690_v62 = vpack.c.bf16 %v617_v61, %v615_v60 }
 0x256   : > { %786 = vmatmul.bf16.gmra.mxu3 %v690_v62 }
 0x25b   : > { %v620_v63 = vpop.f32.mrf.mxu2 }
 0x263   : > { %v622_v0 = vpop.f32.mrf.mxu2 }
 0x264   : > { %v691_v1 = vpack.c.bf16 %v622_v0, %v620_v63 }
 0x266   : > { %791 = vmatmul.bf16.gmra.mxu3 %v691_v1 }
 0x26b   : > { %v625_v2 = vpop.f32.mrf.mxu2 }
 0x273   : > { %v627_v3 = vpop.f32.mrf.mxu2 }
 0x274   : > { %v692_v4 = vpack.c.bf16 %v627_v3, %v625_v2 }
 0x276   : > { %796 = vmatmul.bf16.gmra.mxu3 %v692_v4 }
 0x27b   : > { %v630_v5 = vpop.f32.mrf.mxu2 }
 0x283   : > { %v632_v6 = vpop.f32.mrf.mxu2 }
 0x284   : > { %v693_v7 = vpack.c.bf16 %v632_v6, %v630_v5 }
 0x286   : > { %801 = vmatmul.bf16.gmra.mxu3 %v693_v7 }
 0x28d   : > { %v767_v8 = vpop.f32.mrf.mxu0 }
 0x28e   : > { %807 = vst [vmem:[%s1608_s30] sm:$0xff] %v767_v8 }
 0x295   : > { %v769_v9 = vpop.f32.mrf.mxu0 }
 0x296   : > { %808 = vst [vmem:[%s1608_s30 + $0x8] sm:$0xff] %v769_v9 }
 0x2a3   : > { %v772_v10 = vpop.f32.mrf.mxu0 }
 0x2a4   : > { %809 = vst [vmem:[%s1608_s30 + $0x10] sm:$0xff] %v772_v10 }
 0x2ab   : > { %v774_v11 = vpop.f32.mrf.mxu0 }
 0x2ac   : > { %810 = vst [vmem:[%s1608_s30 + $0x18] sm:$0xff] %v774_v11 }
 0x2b3   : > { %v777_v12 = vpop.f32.mrf.mxu0 }
 0x2b4   : > { %811 = vst [vmem:[%s1608_s30 + $0x20] sm:$0xff] %v777_v12 }
 0x2bb   : > { %v779_v13 = vpop.f32.mrf.mxu0 }
 0x2bc   : > { %812 = vst [vmem:[%s1608_s30 + $0x28] sm:$0xff] %v779_v13 }
 0x2c9   : > { %v782_v14 = vpop.f32.mrf.mxu3 }
 0x2ca   : > { %813 = vst [vmem:[%s1608_s30 + $0x30] sm:$0xff] %v782_v14 }
 0x2d1   : > { %v784_v15 = vpop.f32.mrf.mxu3 }
 0x2d2   : > { %814 = vst [vmem:[%s1608_s30 + $0x38] sm:$0xff] %v784_v15 }
 0x2d9   : > { %v787_v16 = vpop.f32.mrf.mxu3 }
 0x2da   : > { %815 = vst [vmem:[%s1608_s30 + $0x40] sm:$0xff] %v787_v16 }
 0x2e1   : > { %v789_v17 = vpop.f32.mrf.mxu3 }
 0x2e2   : > { %816 = vst [vmem:[%s1608_s30 + $0x48] sm:$0xff] %v789_v17 }
 0x2e9   : > { %v792_v18 = vpop.f32.mrf.mxu3 }
 0x2ea   : > { %817 = vst [vmem:[%s1608_s30 + $0x50] sm:$0xff] %v792_v18 }
 0x2f1   : > { %v794_v19 = vpop.f32.mrf.mxu3 }
 0x2f2   : > { %818 = vst [vmem:[%s1608_s30 + $0x58] sm:$0xff] %v794_v19 }
 0x2f9   : > { %v797_v20 = vpop.f32.mrf.mxu3 }
 0x2fa   : > { %819 = vst [vmem:[%s1608_s30 + $0x60] sm:$0xff] %v797_v20 }
 0x301   : > { %v799_v21 = vpop.f32.mrf.mxu3 }
 0x302   : > { %820 = vst [vmem:[%s1608_s30 + $0x68] sm:$0xff] %v799_v21 }
 0x309   : > { %v802_v22 = vpop.f32.mrf.mxu3 }
 0x30a   : > { %821 = vst [vmem:[%s1608_s30 + $0x70] sm:$0xff] %v802_v22 }
 0x311   : > { %v804_v23 = vpop.f32.mrf.mxu3 }
 0x312   : > { %822 = vst [vmem:[%s1608_s30 + $0x78] sm:$0xff] %v804_v23 }
 0x313   : > { %1357 = shalt.err (!%p1354_p13)
}
 0x314   : > { %s1427_s1 = smov 128   ;;  %s1428_s30 = smov 8  }
 0x315   : > { %1122 = dma.vmem_to_hbm [thread:$0]  (%p1555_p4), %s837_s12, 2048, %s839_s29, %s824_s20, %s1427_s1, %s1427_s1, %s1428_s30  }
 0x316 PF: > { %s853_s27 = sand.u32 1, %s1400_s21   ;;  %p1139_p0 = pnand %p956_p6, %p1563_p7 }
 0x317   : > { %s854_s9 = scalar_lea.sflag [#allocation5], %s853_s27 }
 0x318   : > { %p1140_p2 = pneg %p1139_p0 }
 0x31a   : > { %1395 = dma.done.wait (%p1140_p2), %s854_s9, 2048  }
 0x31b   : > { %1397 = vsyncadd (%p1140_p2), %s854_s9, 4294965248  ;;  %s24_s26 = sadd.s32 1, %s1420_s26   ;;  %s1681_s21 = smov %s1404_s22 }
 0x31c   : > { %p21_p5 = scmp.ge.s32.totalorder %s24_s26, 4   ;;  %s1682_s22 = smov %s1408_s23 }
 0x31d   : > { %s1683_s23 = smov %s1561_s16  ;;  %s1684_s24 = smov %s1416_s25 }
 0x31e   : > { %s1685_s25 = smov %s1687_s10  ;;  %23 = sbr.rel (!%p21_p5) target bundleno = 10 (0xa), region = 109 }
 0x323   :  { %860 = vsyncpa [#allocation4], 1 }
 0x324   :  { %862 = vsyncpa [#allocation4 + $0x1], 1 }
 0x325   :  { %863 = vsyncpa [#allocation7], 1 }
 0x326   :  { %864 = vsyncpa [#allocation10], 1 }
 0x327   :  { %865 = vsyncpa [#allocation5], 1 }
 0x328   :  { %867 = vsyncpa [#allocation5 + $0x1], 1 }

</bundles_post_ra>
